<compile_context>
chip_gen: v7x
topology: tpu7x:2x2x1
jax: 0.10.0
libtpu: 0.0.40
codegen_flags: <defaults>
</compile_context>

<pallas_src>
import jax
import jax.numpy as jnp
from jax.experimental import pallas as pl
from jax.experimental.pallas import tpu as pltpu

LEAKY_SLOPE = 0.2
BN_EPS = 1e-5
LANE = 128


def _round_up(x, m):
    return ((x + m - 1) // m) * m


def _lrelu(v):
    return jnp.where(v > 0, v, LEAKY_SLOPE * v)


def _const_index_map(ndim):
    return lambda *_: (0,) * ndim


# ------------------------------ fused kernel -------------------------------

def _make_fused_kernel(filter_widths, tout0, channels, bt, compute_dtype):
    n_lvl = len(filter_widths) - 1
    n_ops = 2 + 4 * n_lvl + 2   # w0,b0, (wa,ba,wb,bb)*n_lvl, ws,bs

    def kernel(*refs):
        cols_ref = refs[0]
        ops = refs[1:1 + n_ops]
        o_ref = refs[1 + n_ops]
        h_scrs = refs[2 + n_ops:]                       # bt per-sample scratch refs

        # Per-sample chains are fully independent (own scratch ref), so the
        # scheduler can interleave their MXU pushes / epilogues.
        for s in range(bt):
            h_scr = h_scrs[s]

            # ---- expand conv (BN scale folded into w0) + bias + LeakyReLU ----
            cols = cols_ref[s]                          # (tout0, KCin_pad) bf16
            y = jnp.dot(cols, ops[0][...], preferred_element_type=jnp.float32)
            h = _lrelu(y + ops[1][...])                 # (tout0, C) f32
            t_cur = tout0
            wi = 2

            # ---- per level: strided conv + BN + LReLU, then 1x1 + BN + LReLU + res
            for lvl in range(n_lvl):
                k = filter_widths[lvl + 1]
                t_out = t_cur // k
                wa_ref, ba_ref, wb_ref, bb_ref = ops[wi], ops[wi + 1], ops[wi + 2], ops[wi + 3]
                wi += 4

                # Stash activation in VMEM so strided temporal selections are cheap.
                h_scr[pl.ds(0, t_cur), :] = h
                # Strided tap reads (stride == kernel).  Middle tap doubles as the
                # residual x[:, fw//2::fw] -- in-VMEM, no HBM trip, no extra load.
                taps = [h_scr[pl.ds(tap, t_out, stride=k), :] for tap in range(k)]
                res = taps[k // 2]                      # (t_out, C) f32

                acc = jnp.dot(taps[0].astype(compute_dtype), wa_ref[0],
                              preferred_element_type=jnp.float32)
                for tap in range(1, k):
                    acc = acc + jnp.dot(taps[tap].astype(compute_dtype), wa_ref[tap],
                                        preferred_element_type=jnp.float32)
                h1 = _lrelu(acc + ba_ref[...])          # f32 epilogue

                z = jnp.dot(h1.astype(compute_dtype), wb_ref[...],
                            preferred_element_type=jnp.float32)
                h = res + _lrelu(z + bb_ref[...])       # (t_out, C) f32
                t_cur = t_out

            # ---- shrink 1x1 conv, lane-dense 128-wide output slab ----
            out = jnp.dot(h.astype(compute_dtype), ops[wi][...],
                          preferred_element_type=jnp.float32) + ops[wi + 1][...]
            o_ref[s] = out.astype(o_ref.dtype)

    return kernel


# ------------------------------- parameters --------------------------------

def _fold_bn(gamma, beta, mean, var):
    scale = gamma * jax.lax.rsqrt(var + BN_EPS)
    return scale, beta - mean * scale


def init_params(key, num_joints_in, in_features, filter_widths, channels, latten):
    cin = num_joints_in * in_features
    keys = iter(jax.random.split(key, 64))

    def conv_w(cout, ci, k):
        return jax.random.normal(next(keys), (cout, ci, k), jnp.float32) / jnp.sqrt(ci * k)

    def bn(c):
        gamma = 1.0 + 0.1 * jax.random.normal(next(keys), (c,), jnp.float32)
        beta = 0.1 * jax.random.normal(next(keys), (c,), jnp.float32)
        mean = 0.1 * jax.random.normal(next(keys), (c,), jnp.float32)
        var = 1.0 + 0.1 * jax.random.uniform(next(keys), (c,), jnp.float32)
        return gamma, beta, mean, var

    p = {'expand_conv': conv_w(channels, cin, filter_widths[0]),
         'expand_bn': bn(channels),
         'layers_conv': [], 'layers_bn': []}
    for i in range(1, len(filter_widths)):
        p['layers_conv'].append(conv_w(channels, channels, filter_widths[i]))
        p['layers_bn'].append(bn(channels))
        p['layers_conv'].append(conv_w(channels, channels, 1))
        p['layers_bn'].append(bn(channels))
    p['shrink_w'] = conv_w(latten, channels, 1)
    p['shrink_b'] = 0.1 * jax.random.normal(next(keys), (latten,), jnp.float32)
    return p


# -------------------------------- forward ----------------------------------

def temporal_block_forward(params, x_nct, filter_widths, compute_dtype=jnp.bfloat16):
    """Eval-mode forward of TemporalBlock (Optimize1f=True, causal=False)."""
    # TODO(synk): Dropout / training-mode (batch-stats) BatchNorm are not
    # implemented; this is the deterministic eval-mode forward.
    n, cin, t = x_nct.shape
    channels = params['expand_conv'].shape[0]
    latten = params['shrink_w'].shape[0]
    k0 = filter_widths[0]
    tout0 = (t - k0) // k0 + 1
    kcin_pad = _round_up(k0 * cin, LANE)
    lat_pad = _round_up(latten, LANE)

    # im2col for the expand conv (stride == kernel => non-overlapping windows),
    # contraction zero-padded to a full 128-lane multiple, bf16 for MXU + DMA.
    x_ntc = jnp.transpose(x_nct, (0, 2, 1))
    cols = x_ntc[:, :tout0 * k0, :].reshape(n, tout0, k0 * cin)
    cols = jnp.pad(cols, ((0, 0), (0, 0), (0, kcin_pad - k0 * cin))).astype(compute_dtype)

    # Fold BN (running stats) scale into each conv weight once; biases stay f32.
    ops = []
    s, b = _fold_bn(*params['expand_bn'])
    w0 = jnp.transpose(params['expand_conv'], (2, 1, 0)).reshape(k0 * cin, channels)
    w0 = jnp.pad(w0 * s[None, :], ((0, kcin_pad - k0 * cin), (0, 0)))
    ops += [w0.astype(compute_dtype), b.reshape(1, channels).astype(jnp.float32)]

    t_cur = tout0
    flops = 2 * n * tout0 * kcin_pad * channels
    for i in range(len(filter_widths) - 1):
        k = filter_widths[i + 1]
        t_cur //= k
        sa, ba = _fold_bn(*params['layers_bn'][2 * i])
        wa = jnp.transpose(params['layers_conv'][2 * i], (2, 1, 0)) * sa[None, None, :]
        sb, bb = _fold_bn(*params['layers_bn'][2 * i + 1])
        wb = jnp.transpose(params['layers_conv'][2 * i + 1][:, :, 0]) * sb[None, :]
        ops += [wa.astype(compute_dtype), ba.reshape(1, channels).astype(jnp.float32),
                wb.astype(compute_dtype), bb.reshape(1, channels).astype(jnp.float32)]
        flops += 2 * n * t_cur * channels * (k * channels + channels)

    ws = jnp.pad(jnp.transpose(params['shrink_w'][:, :, 0]), ((0, 0), (0, lat_pad - latten)))
    bs = jnp.pad(params['shrink_b'], (0, lat_pad - latten)).reshape(1, lat_pad)
    ops += [ws.astype(compute_dtype), bs.astype(jnp.float32)]
    flops += 2 * n * t_cur * channels * lat_pad

    # Batch chunk size: largest divisor of N (capped) whose per-step activation
    # scratch stays small.  bt samples per grid step => fewer per-step
    # overheads, bigger DMAs, and bt independent chains to hide MXU latency.
    scratch_bytes = tout0 * channels * 4
    bt = 1
    for cand in (8, 4, 2, 1):
        if n % cand == 0 and cand * scratch_bytes <= 4 * 1024 * 1024:
            bt = cand
            break

    # One fused pallas_call: grid over batch chunks (parallel => pipelined +
    # megacore shardable); weights use constant index_maps so they stay
    # VMEM-resident across grid steps.
    in_specs = [pl.BlockSpec((bt, tout0, kcin_pad), lambda bi: (bi, 0, 0))]
    for a in ops:
        in_specs.append(pl.BlockSpec(a.shape, _const_index_map(a.ndim)))
    out_spec = pl.BlockSpec((bt, t_cur, lat_pad), lambda bi: (bi, 0, 0))

    bytes_accessed = int(cols.size) * 2 \
        + sum(int(a.size) * int(a.dtype.itemsize) for a in ops) \
        + n * t_cur * lat_pad * 4
    kernel = _make_fused_kernel(tuple(filter_widths), tout0, channels, bt, compute_dtype)

    out = pl.pallas_call(
        kernel,
        out_shape=jax.ShapeDtypeStruct((n, t_cur, lat_pad), jnp.float32),
        grid=(n // bt,),
        in_specs=in_specs,
        out_specs=out_spec,
        scratch_shapes=[pltpu.VMEM((tout0, channels), jnp.float32) for _ in range(bt)],
        compiler_params=pltpu.CompilerParams(
            dimension_semantics=("parallel",),
            vmem_limit_bytes=32 * 1024 * 1024),
        cost_estimate=pl.CostEstimate(flops=int(flops), transcendentals=0,
                                      bytes_accessed=int(bytes_accessed)),
    )(cols, *ops)

    out = out[..., :latten]                                   # drop lane padding
    nb, tf, l = out.shape
    # permute(0,2,1) in torch == our NTC layout; then reshape + unsqueeze(1).
    return out.reshape(nb * tf, l)[:, None, :]                # (N*Tout, 1, latten)


# ------------------------- pure-JAX reference check -------------------------

def _ref_forward(params, x, filter_widths):
    def conv1d(x, w, stride):
        return jax.lax.conv_general_dilated(
            x, w, (stride,), 'VALID', dimension_numbers=('NCH', 'OIH', 'NCH'))

    def bn(x, g, be, m, v):
        return (g[None, :, None] * (x - m[None, :, None])
                / jnp.sqrt(v[None, :, None] + BN_EPS) + be[None, :, None])

    def lrelu(x):
        return jnp.where(x > 0, x, LEAKY_SLOPE * x)

    x = lrelu(bn(conv1d(x, params['expand_conv'], filter_widths[0]), *params['expand_bn']))
    for i in range(len(filter_widths) - 1):
        fw = filter_widths[i + 1]
        res = x[:, :, fw // 2::fw]
        x = lrelu(bn(conv1d(x, params['layers_conv'][2 * i], fw), *params['layers_bn'][2 * i]))
        x = res + lrelu(bn(conv1d(x, params['layers_conv'][2 * i + 1], 1),
                           *params['layers_bn'][2 * i + 1]))
    x = conv1d(x, params['shrink_w'], 1) + params['shrink_b'][None, :, None]
    x = jnp.transpose(x, (0, 2, 1))
    N, T, L = x.shape
    return x.reshape(N * T, L)[:, None, :]


# ---------------------------------- main ------------------------------------

if __name__ == "__main__":
    # Small synthetic config:
    num_joints_in, in_features = 16, 2        # C_in = 32
    filter_widths = [3, 3]
    channels, latten = 128, 64
    N, T = 2, 18                              # 18 -> 6 -> 2 output frames

    key = jax.random.PRNGKey(0)
    pkey, xkey = jax.random.split(key)
    params = init_params(pkey, num_joints_in, in_features, filter_widths, channels, latten)
    x = jax.random.normal(xkey, (N, num_joints_in * in_features, T), jnp.float32)

    fwd = jax.jit(lambda p, xx: temporal_block_forward(p, xx, filter_widths))
    out = jax.block_until_ready(fwd(params, x))
    ref = jax.block_until_ready(_ref_forward(params, x, filter_widths))

    assert out.shape == (N * 2, 1, latten), out.shape
    # bf16 matmul inputs (f32 accumulation + f32 epilogue) vs an f32 reference.
    assert jnp.allclose(out, ref, atol=5e-2, rtol=5e-2), float(jnp.max(jnp.abs(out - ref)))
    print("KERNEL_OK")
</pallas_src>

<mosaic_0001>
module attributes {stable_mosaic.version = 11 : i64} {
  func.func @kernel(%arg0: i32, %arg1: memref<2x6x128xbf16, #tpu.memory_space<vmem>>, %arg2: memref<128x128xbf16, #tpu.memory_space<vmem>>, %arg3: memref<1x128xf32, #tpu.memory_space<vmem>>, %arg4: memref<3x128x128xbf16, #tpu.memory_space<vmem>>, %arg5: memref<1x128xf32, #tpu.memory_space<vmem>>, %arg6: memref<128x128xbf16, #tpu.memory_space<vmem>>, %arg7: memref<1x128xf32, #tpu.memory_space<vmem>>, %arg8: memref<128x128xbf16, #tpu.memory_space<vmem>>, %arg9: memref<1x128xf32, #tpu.memory_space<vmem>>, %arg10: memref<2x2x128xf32, #tpu.memory_space<vmem>>, %arg11: memref<6x128xf32, #tpu.memory_space<vmem>>, %arg12: memref<6x128xf32, #tpu.memory_space<vmem>>) attributes {dimension_semantics = [#tpu.dimension_semantics<parallel>], iteration_bounds = array<i64: 1>, scalar_prefetch = 0 : i64, scratch_operands = 2 : i64, tpu.core_type = #tpu.core_type<tc>, window_params = [{transform_indices = @transform_0, window_bounds = array<i64: 2, 6, 128>}, {pipeline_mode = #tpu.pipeline_mode<synchronous>, transform_indices = @transform_1, window_bounds = array<i64: 128, 128>}, {pipeline_mode = #tpu.pipeline_mode<synchronous>, transform_indices = @transform_2, window_bounds = array<i64: 1, 128>}, {pipeline_mode = #tpu.pipeline_mode<synchronous>, transform_indices = @transform_3, window_bounds = array<i64: 3, 128, 128>}, {pipeline_mode = #tpu.pipeline_mode<synchronous>, transform_indices = @transform_4, window_bounds = array<i64: 1, 128>}, {pipeline_mode = #tpu.pipeline_mode<synchronous>, transform_indices = @transform_5, window_bounds = array<i64: 128, 128>}, {pipeline_mode = #tpu.pipeline_mode<synchronous>, transform_indices = @transform_6, window_bounds = array<i64: 1, 128>}, {pipeline_mode = #tpu.pipeline_mode<synchronous>, transform_indices = @transform_7, window_bounds = array<i64: 128, 128>}, {pipeline_mode = #tpu.pipeline_mode<synchronous>, transform_indices = @transform_8, window_bounds = array<i64: 1, 128>}, {transform_indices = @transform_9, window_bounds = array<i64: 2, 2, 128>}]} {
    %c0 = arith.constant 0 : index
    %c0_0 = arith.constant 0 : index
    %c0_1 = arith.constant 0 : index
    %0 = vector.load %arg1[%c0, %c0_0, %c0_1] : memref<2x6x128xbf16, #tpu.memory_space<vmem>>, vector<1x6x128xbf16>
    %1 = vector.shape_cast %0 : vector<1x6x128xbf16> to vector<6x128xbf16>
    %c0_2 = arith.constant 0 : index
    %c0_3 = arith.constant 0 : index
    %2 = vector.load %arg2[%c0_2, %c0_3] : memref<128x128xbf16, #tpu.memory_space<vmem>>, vector<128x128xbf16>
    %cst = arith.constant dense<0.000000e+00> : vector<6x128xf32>
    %3 = tpu.matmul %1, %2, %cst {dimension_numbers = #tpu.dot_dimension_numbers<[1], [0], [0], [1], [0, 0, 1, 1], [], []>} : vector<6x128xbf16>, vector<128x128xbf16>, vector<6x128xf32> -> vector<6x128xf32>
    %c0_4 = arith.constant 0 : index
    %c0_5 = arith.constant 0 : index
    %4 = vector.load %arg3[%c0_4, %c0_5] : memref<1x128xf32, #tpu.memory_space<vmem>>, vector<1x128xf32>
    %5 = vector.broadcast %4 : vector<1x128xf32> to vector<6x128xf32>
    %6 = arith.addf %3, %5 : vector<6x128xf32>
    %cst_6 = arith.constant 0.000000e+00 : f32
    %7 = vector.broadcast %cst_6 : f32 to vector<6x128xf32>
    %8 = arith.cmpf ogt, %6, %7 : vector<6x128xf32>
    %cst_7 = arith.constant 2.000000e-01 : f32
    %9 = vector.broadcast %cst_7 : f32 to vector<6x128xf32>
    %10 = arith.mulf %9, %6 : vector<6x128xf32>
    %11 = arith.select %8, %6, %10 : vector<6x128xi1>, vector<6x128xf32>
    %c0_8 = arith.constant 0 : index
    %c0_9 = arith.constant 0 : index
    %12 = vector.load %arg11[%c0_8, %c0_9] : memref<6x128xf32, #tpu.memory_space<vmem>>, vector<6x128xf32>
    tpu.vector_store %arg11[%c0_8, %c0_9], %11 {strides = array<i32>} : memref<6x128xf32, #tpu.memory_space<vmem>>, vector<6x128xf32>,
    %c0_10 = arith.constant 0 : index
    %c0_11 = arith.constant 0 : index
    %13 = tpu.strided_load %arg11[%c0_10, %c0_11] {strides = array<i32: 3, 1>} : memref<6x128xf32, #tpu.memory_space<vmem>>, vector<2x128xf32>
    %c1 = arith.constant 1 : index
    %c0_12 = arith.constant 0 : index
    %14 = tpu.strided_load %arg11[%c1, %c0_12] {strides = array<i32: 3, 1>} : memref<6x128xf32, #tpu.memory_space<vmem>>, vector<2x128xf32>
    %c2 = arith.constant 2 : index
    %c0_13 = arith.constant 0 : index
    %15 = tpu.strided_load %arg11[%c2, %c0_13] {strides = array<i32: 3, 1>} : memref<6x128xf32, #tpu.memory_space<vmem>>, vector<2x128xf32>
    %16 = arith.truncf %13 : vector<2x128xf32> to vector<2x128xbf16>
    %c0_14 = arith.constant 0 : index
    %c0_15 = arith.constant 0 : index
    %c0_16 = arith.constant 0 : index
    %17 = vector.load %arg4[%c0_14, %c0_15, %c0_16] : memref<3x128x128xbf16, #tpu.memory_space<vmem>>, vector<1x128x128xbf16>
    %18 = vector.shape_cast %17 : vector<1x128x128xbf16> to vector<128x128xbf16>
    %cst_17 = arith.constant dense<0.000000e+00> : vector<2x128xf32>
    %19 = tpu.matmul %16, %18, %cst_17 {dimension_numbers = #tpu.dot_dimension_numbers<[1], [0], [0], [1], [0, 0, 1, 1], [], []>} : vector<2x128xbf16>, vector<128x128xbf16>, vector<2x128xf32> -> vector<2x128xf32>
    %20 = arith.truncf %14 : vector<2x128xf32> to vector<2x128xbf16>
    %c1_18 = arith.constant 1 : index
    %c0_19 = arith.constant 0 : index
    %c0_20 = arith.constant 0 : index
    %21 = vector.load %arg4[%c1_18, %c0_19, %c0_20] : memref<3x128x128xbf16, #tpu.memory_space<vmem>>, vector<1x128x128xbf16>
    %22 = vector.shape_cast %21 : vector<1x128x128xbf16> to vector<128x128xbf16>
    %cst_21 = arith.constant dense<0.000000e+00> : vector<2x128xf32>
    %23 = tpu.matmul %20, %22, %cst_21 {dimension_numbers = #tpu.dot_dimension_numbers<[1], [0], [0], [1], [0, 0, 1, 1], [], []>} : vector<2x128xbf16>, vector<128x128xbf16>, vector<2x128xf32> -> vector<2x128xf32>
    %24 = arith.addf %19, %23 : vector<2x128xf32>
    %25 = arith.truncf %15 : vector<2x128xf32> to vector<2x128xbf16>
    %c2_22 = arith.constant 2 : index
    %c0_23 = arith.constant 0 : index
    %c0_24 = arith.constant 0 : index
    %26 = vector.load %arg4[%c2_22, %c0_23, %c0_24] : memref<3x128x128xbf16, #tpu.memory_space<vmem>>, vector<1x128x128xbf16>
    %27 = vector.shape_cast %26 : vector<1x128x128xbf16> to vector<128x128xbf16>
    %cst_25 = arith.constant dense<0.000000e+00> : vector<2x128xf32>
    %28 = tpu.matmul %25, %27, %cst_25 {dimension_numbers = #tpu.dot_dimension_numbers<[1], [0], [0], [1], [0, 0, 1, 1], [], []>} : vector<2x128xbf16>, vector<128x128xbf16>, vector<2x128xf32> -> vector<2x128xf32>
    %29 = arith.addf %24, %28 : vector<2x128xf32>
    %c0_26 = arith.constant 0 : index
    %c0_27 = arith.constant 0 : index
    %30 = vector.load %arg5[%c0_26, %c0_27] : memref<1x128xf32, #tpu.memory_space<vmem>>, vector<1x128xf32>
    %31 = vector.broadcast %30 : vector<1x128xf32> to vector<2x128xf32>
    %32 = arith.addf %29, %31 : vector<2x128xf32>
    %cst_28 = arith.constant 0.000000e+00 : f32
    %33 = vector.broadcast %cst_28 : f32 to vector<2x128xf32>
    %34 = arith.cmpf ogt, %32, %33 : vector<2x128xf32>
    %cst_29 = arith.constant 2.000000e-01 : f32
    %35 = vector.broadcast %cst_29 : f32 to vector<2x128xf32>
    %36 = arith.mulf %35, %32 : vector<2x128xf32>
    %37 = arith.select %34, %32, %36 : vector<2x128xi1>, vector<2x128xf32>
    %38 = arith.truncf %37 : vector<2x128xf32> to vector<2x128xbf16>
    %c0_30 = arith.constant 0 : index
    %c0_31 = arith.constant 0 : index
    %39 = vector.load %arg6[%c0_30, %c0_31] : memref<128x128xbf16, #tpu.memory_space<vmem>>, vector<128x128xbf16>
    %cst_32 = arith.constant dense<0.000000e+00> : vector<2x128xf32>
    %40 = tpu.matmul %38, %39, %cst_32 {dimension_numbers = #tpu.dot_dimension_numbers<[1], [0], [0], [1], [0, 0, 1, 1], [], []>} : vector<2x128xbf16>, vector<128x128xbf16>, vector<2x128xf32> -> vector<2x128xf32>
    %c0_33 = arith.constant 0 : index
    %c0_34 = arith.constant 0 : index
    %41 = vector.load %arg7[%c0_33, %c0_34] : memref<1x128xf32, #tpu.memory_space<vmem>>, vector<1x128xf32>
    %42 = vector.broadcast %41 : vector<1x128xf32> to vector<2x128xf32>
    %43 = arith.addf %40, %42 : vector<2x128xf32>
    %cst_35 = arith.constant 0.000000e+00 : f32
    %44 = vector.broadcast %cst_35 : f32 to vector<2x128xf32>
    %45 = arith.cmpf ogt, %43, %44 : vector<2x128xf32>
    %cst_36 = arith.constant 2.000000e-01 : f32
    %46 = vector.broadcast %cst_36 : f32 to vector<2x128xf32>
    %47 = arith.mulf %46, %43 : vector<2x128xf32>
    %48 = arith.select %45, %43, %47 : vector<2x128xi1>, vector<2x128xf32>
    %49 = arith.addf %14, %48 : vector<2x128xf32>
    %50 = arith.truncf %49 : vector<2x128xf32> to vector<2x128xbf16>
    %c0_37 = arith.constant 0 : index
    %c0_38 = arith.constant 0 : index
    %51 = vector.load %arg8[%c0_37, %c0_38] : memref<128x128xbf16, #tpu.memory_space<vmem>>, vector<128x128xbf16>
    %cst_39 = arith.constant dense<0.000000e+00> : vector<2x128xf32>
    %52 = tpu.matmul %50, %51, %cst_39 {dimension_numbers = #tpu.dot_dimension_numbers<[1], [0], [0], [1], [0, 0, 1, 1], [], []>} : vector<2x128xbf16>, vector<128x128xbf16>, vector<2x128xf32> -> vector<2x128xf32>
    %c0_40 = arith.constant 0 : index
    %c0_41 = arith.constant 0 : index
    %53 = vector.load %arg9[%c0_40, %c0_41] : memref<1x128xf32, #tpu.memory_space<vmem>>, vector<1x128xf32>
    %54 = vector.broadcast %53 : vector<1x128xf32> to vector<2x128xf32>
    %55 = arith.addf %52, %54 : vector<2x128xf32>
    %c0_42 = arith.constant 0 : index
    %c0_43 = arith.constant 0 : index
    %c0_44 = arith.constant 0 : index
    %56 = vector.load %arg10[%c0_42, %c0_43, %c0_44] : memref<2x2x128xf32, #tpu.memory_space<vmem>>, vector<1x2x128xf32>
    %57 = vector.shape_cast %56 : vector<1x2x128xf32> to vector<2x128xf32>
    %58 = vector.shape_cast %55 : vector<2x128xf32> to vector<1x2x128xf32>
    tpu.vector_store %arg10[%c0_42, %c0_43, %c0_44], %58 {strides = array<i32>} : memref<2x2x128xf32, #tpu.memory_space<vmem>>, vector<1x2x128xf32>,
    %c1_45 = arith.constant 1 : index
    %c0_46 = arith.constant 0 : index
    %c0_47 = arith.constant 0 : index
    %59 = vector.load %arg1[%c1_45, %c0_46, %c0_47] : memref<2x6x128xbf16, #tpu.memory_space<vmem>>, vector<1x6x128xbf16>
    %60 = vector.shape_cast %59 : vector<1x6x128xbf16> to vector<6x128xbf16>
    %c0_48 = arith.constant 0 : index
    %c0_49 = arith.constant 0 : index
    %61 = vector.load %arg2[%c0_48, %c0_49] : memref<128x128xbf16, #tpu.memory_space<vmem>>, vector<128x128xbf16>
    %cst_50 = arith.constant dense<0.000000e+00> : vector<6x128xf32>
    %62 = tpu.matmul %60, %61, %cst_50 {dimension_numbers = #tpu.dot_dimension_numbers<[1], [0], [0], [1], [0, 0, 1, 1], [], []>} : vector<6x128xbf16>, vector<128x128xbf16>, vector<6x128xf32> -> vector<6x128xf32>
    %c0_51 = arith.constant 0 : index
    %c0_52 = arith.constant 0 : index
    %63 = vector.load %arg3[%c0_51, %c0_52] : memref<1x128xf32, #tpu.memory_space<vmem>>, vector<1x128xf32>
    %64 = vector.broadcast %63 : vector<1x128xf32> to vector<6x128xf32>
    %65 = arith.addf %62, %64 : vector<6x128xf32>
    %cst_53 = arith.constant 0.000000e+00 : f32
    %66 = vector.broadcast %cst_53 : f32 to vector<6x128xf32>
    %67 = arith.cmpf ogt, %65, %66 : vector<6x128xf32>
    %cst_54 = arith.constant 2.000000e-01 : f32
    %68 = vector.broadcast %cst_54 : f32 to vector<6x128xf32>
    %69 = arith.mulf %68, %65 : vector<6x128xf32>
    %70 = arith.select %67, %65, %69 : vector<6x128xi1>, vector<6x128xf32>
    %c0_55 = arith.constant 0 : index
    %c0_56 = arith.constant 0 : index
    %71 = vector.load %arg12[%c0_55, %c0_56] : memref<6x128xf32, #tpu.memory_space<vmem>>, vector<6x128xf32>
    tpu.vector_store %arg12[%c0_55, %c0_56], %70 {strides = array<i32>} : memref<6x128xf32, #tpu.memory_space<vmem>>, vector<6x128xf32>,
    %c0_57 = arith.constant 0 : index
    %c0_58 = arith.constant 0 : index
    %72 = tpu.strided_load %arg12[%c0_57, %c0_58] {strides = array<i32: 3, 1>} : memref<6x128xf32, #tpu.memory_space<vmem>>, vector<2x128xf32>
    %c1_59 = arith.constant 1 : index
    %c0_60 = arith.constant 0 : index
    %73 = tpu.strided_load %arg12[%c1_59, %c0_60] {strides = array<i32: 3, 1>} : memref<6x128xf32, #tpu.memory_space<vmem>>, vector<2x128xf32>
    %c2_61 = arith.constant 2 : index
    %c0_62 = arith.constant 0 : index
    %74 = tpu.strided_load %arg12[%c2_61, %c0_62] {strides = array<i32: 3, 1>} : memref<6x128xf32, #tpu.memory_space<vmem>>, vector<2x128xf32>
    %75 = arith.truncf %72 : vector<2x128xf32> to vector<2x128xbf16>
    %c0_63 = arith.constant 0 : index
    %c0_64 = arith.constant 0 : index
    %c0_65 = arith.constant 0 : index
    %76 = vector.load %arg4[%c0_63, %c0_64, %c0_65] : memref<3x128x128xbf16, #tpu.memory_space<vmem>>, vector<1x128x128xbf16>
    %77 = vector.shape_cast %76 : vector<1x128x128xbf16> to vector<128x128xbf16>
    %cst_66 = arith.constant dense<0.000000e+00> : vector<2x128xf32>
    %78 = tpu.matmul %75, %77, %cst_66 {dimension_numbers = #tpu.dot_dimension_numbers<[1], [0], [0], [1], [0, 0, 1, 1], [], []>} : vector<2x128xbf16>, vector<128x128xbf16>, vector<2x128xf32> -> vector<2x128xf32>
    %79 = arith.truncf %73 : vector<2x128xf32> to vector<2x128xbf16>
    %c1_67 = arith.constant 1 : index
    %c0_68 = arith.constant 0 : index
    %c0_69 = arith.constant 0 : index
    %80 = vector.load %arg4[%c1_67, %c0_68, %c0_69] : memref<3x128x128xbf16, #tpu.memory_space<vmem>>, vector<1x128x128xbf16>
    %81 = vector.shape_cast %80 : vector<1x128x128xbf16> to vector<128x128xbf16>
    %cst_70 = arith.constant dense<0.000000e+00> : vector<2x128xf32>
    %82 = tpu.matmul %79, %81, %cst_70 {dimension_numbers = #tpu.dot_dimension_numbers<[1], [0], [0], [1], [0, 0, 1, 1], [], []>} : vector<2x128xbf16>, vector<128x128xbf16>, vector<2x128xf32> -> vector<2x128xf32>
    %83 = arith.addf %78, %82 : vector<2x128xf32>
    %84 = arith.truncf %74 : vector<2x128xf32> to vector<2x128xbf16>
    %c2_71 = arith.constant 2 : index
    %c0_72 = arith.constant 0 : index
    %c0_73 = arith.constant 0 : index
    %85 = vector.load %arg4[%c2_71, %c0_72, %c0_73] : memref<3x128x128xbf16, #tpu.memory_space<vmem>>, vector<1x128x128xbf16>
    %86 = vector.shape_cast %85 : vector<1x128x128xbf16> to vector<128x128xbf16>
    %cst_74 = arith.constant dense<0.000000e+00> : vector<2x128xf32>
    %87 = tpu.matmul %84, %86, %cst_74 {dimension_numbers = #tpu.dot_dimension_numbers<[1], [0], [0], [1], [0, 0, 1, 1], [], []>} : vector<2x128xbf16>, vector<128x128xbf16>, vector<2x128xf32> -> vector<2x128xf32>
    %88 = arith.addf %83, %87 : vector<2x128xf32>
    %c0_75 = arith.constant 0 : index
    %c0_76 = arith.constant 0 : index
    %89 = vector.load %arg5[%c0_75, %c0_76] : memref<1x128xf32, #tpu.memory_space<vmem>>, vector<1x128xf32>
    %90 = vector.broadcast %89 : vector<1x128xf32> to vector<2x128xf32>
    %91 = arith.addf %88, %90 : vector<2x128xf32>
    %cst_77 = arith.constant 0.000000e+00 : f32
    %92 = vector.broadcast %cst_77 : f32 to vector<2x128xf32>
    %93 = arith.cmpf ogt, %91, %92 : vector<2x128xf32>
    %cst_78 = arith.constant 2.000000e-01 : f32
    %94 = vector.broadcast %cst_78 : f32 to vector<2x128xf32>
    %95 = arith.mulf %94, %91 : vector<2x128xf32>
    %96 = arith.select %93, %91, %95 : vector<2x128xi1>, vector<2x128xf32>
    %97 = arith.truncf %96 : vector<2x128xf32> to vector<2x128xbf16>
    %c0_79 = arith.constant 0 : index
    %c0_80 = arith.constant 0 : index
    %98 = vector.load %arg6[%c0_79, %c0_80] : memref<128x128xbf16, #tpu.memory_space<vmem>>, vector<128x128xbf16>
    %cst_81 = arith.constant dense<0.000000e+00> : vector<2x128xf32>
    %99 = tpu.matmul %97, %98, %cst_81 {dimension_numbers = #tpu.dot_dimension_numbers<[1], [0], [0], [1], [0, 0, 1, 1], [], []>} : vector<2x128xbf16>, vector<128x128xbf16>, vector<2x128xf32> -> vector<2x128xf32>
    %c0_82 = arith.constant 0 : index
    %c0_83 = arith.constant 0 : index
    %100 = vector.load %arg7[%c0_82, %c0_83] : memref<1x128xf32, #tpu.memory_space<vmem>>, vector<1x128xf32>
    %101 = vector.broadcast %100 : vector<1x128xf32> to vector<2x128xf32>
    %102 = arith.addf %99, %101 : vector<2x128xf32>
    %cst_84 = arith.constant 0.000000e+00 : f32
    %103 = vector.broadcast %cst_84 : f32 to vector<2x128xf32>
    %104 = arith.cmpf ogt, %102, %103 : vector<2x128xf32>
    %cst_85 = arith.constant 2.000000e-01 : f32
    %105 = vector.broadcast %cst_85 : f32 to vector<2x128xf32>
    %106 = arith.mulf %105, %102 : vector<2x128xf32>
    %107 = arith.select %104, %102, %106 : vector<2x128xi1>, vector<2x128xf32>
    %108 = arith.addf %73, %107 : vector<2x128xf32>
    %109 = arith.truncf %108 : vector<2x128xf32> to vector<2x128xbf16>
    %c0_86 = arith.constant 0 : index
    %c0_87 = arith.constant 0 : index
    %110 = vector.load %arg8[%c0_86, %c0_87] : memref<128x128xbf16, #tpu.memory_space<vmem>>, vector<128x128xbf16>
    %cst_88 = arith.constant dense<0.000000e+00> : vector<2x128xf32>
    %111 = tpu.matmul %109, %110, %cst_88 {dimension_numbers = #tpu.dot_dimension_numbers<[1], [0], [0], [1], [0, 0, 1, 1], [], []>} : vector<2x128xbf16>, vector<128x128xbf16>, vector<2x128xf32> -> vector<2x128xf32>
    %c0_89 = arith.constant 0 : index
    %c0_90 = arith.constant 0 : index
    %112 = vector.load %arg9[%c0_89, %c0_90] : memref<1x128xf32, #tpu.memory_space<vmem>>, vector<1x128xf32>
    %113 = vector.broadcast %112 : vector<1x128xf32> to vector<2x128xf32>
    %114 = arith.addf %111, %113 : vector<2x128xf32>
    %c1_91 = arith.constant 1 : index
    %c0_92 = arith.constant 0 : index
    %c0_93 = arith.constant 0 : index
    %115 = vector.load %arg10[%c1_91, %c0_92, %c0_93] : memref<2x2x128xf32, #tpu.memory_space<vmem>>, vector<1x2x128xf32>
    %116 = vector.shape_cast %115 : vector<1x2x128xf32> to vector<2x128xf32>
    %117 = vector.shape_cast %114 : vector<2x128xf32> to vector<1x2x128xf32>
    tpu.vector_store %arg10[%c1_91, %c0_92, %c0_93], %117 {strides = array<i32>} : memref<2x2x128xf32, #tpu.memory_space<vmem>>, vector<1x2x128xf32>,
    return
  }
  func.func @transform_0(%arg0: i32) -> (i32, i32, i32) {
    %c0_i32 = arith.constant 0 : i32
    %c0_i32_0 = arith.constant 0 : i32
    %c0_i32_1 = arith.constant 0 : i32
    return %arg0, %c0_i32, %c0_i32_0 : i32, i32, i32
  }
  func.func @transform_1(%arg0: i32) -> (i32, i32) {
    %c0_i32 = arith.constant 0 : i32
    %c0_i32_0 = arith.constant 0 : i32
    %c0_i32_1 = arith.constant 0 : i32
    return %c0_i32, %c0_i32_0 : i32, i32
  }
  func.func @transform_2(%arg0: i32) -> (i32, i32) {
    %c0_i32 = arith.constant 0 : i32
    %c0_i32_0 = arith.constant 0 : i32
    %c0_i32_1 = arith.constant 0 : i32
    return %c0_i32, %c0_i32_0 : i32, i32
  }
  func.func @transform_3(%arg0: i32) -> (i32, i32, i32) {
    %c0_i32 = arith.constant 0 : i32
    %c0_i32_0 = arith.constant 0 : i32
    %c0_i32_1 = arith.constant 0 : i32
    %c0_i32_2 = arith.constant 0 : i32
    return %c0_i32, %c0_i32_0, %c0_i32_1 : i32, i32, i32
  }
  func.func @transform_4(%arg0: i32) -> (i32, i32) {
    %c0_i32 = arith.constant 0 : i32
    %c0_i32_0 = arith.constant 0 : i32
    %c0_i32_1 = arith.constant 0 : i32
    return %c0_i32, %c0_i32_0 : i32, i32
  }
  func.func @transform_5(%arg0: i32) -> (i32, i32) {
    %c0_i32 = arith.constant 0 : i32
    %c0_i32_0 = arith.constant 0 : i32
    %c0_i32_1 = arith.constant 0 : i32
    return %c0_i32, %c0_i32_0 : i32, i32
  }
  func.func @transform_6(%arg0: i32) -> (i32, i32) {
    %c0_i32 = arith.constant 0 : i32
    %c0_i32_0 = arith.constant 0 : i32
    %c0_i32_1 = arith.constant 0 : i32
    return %c0_i32, %c0_i32_0 : i32, i32
  }
  func.func @transform_7(%arg0: i32) -> (i32, i32) {
    %c0_i32 = arith.constant 0 : i32
    %c0_i32_0 = arith.constant 0 : i32
    %c0_i32_1 = arith.constant 0 : i32
    return %c0_i32, %c0_i32_0 : i32, i32
  }
  func.func @transform_8(%arg0: i32) -> (i32, i32) {
    %c0_i32 = arith.constant 0 : i32
    %c0_i32_0 = arith.constant 0 : i32
    %c0_i32_1 = arith.constant 0 : i32
    return %c0_i32, %c0_i32_0 : i32, i32
  }
  func.func @transform_9(%arg0: i32) -> (i32, i32, i32) {
    %c0_i32 = arith.constant 0 : i32
    %c0_i32_0 = arith.constant 0 : i32
    %c0_i32_1 = arith.constant 0 : i32
    return %arg0, %c0_i32, %c0_i32_0 : i32, i32, i32
  }
}

</mosaic_0001>

<bundles_post_ra>
// kernel: _lambda_.1
= control target key start
LH: loop header
LB: loop body
LE: loop exit
PB: predicated region body
PF: predicated region fallthrough
CT: control target
= control target key end

     0   :  { %v2050_v1 = vmov 0.0   ;;  %vm2051_vm0 = vmmov 0   ;;  %s2565_s0 = inlined_call_operand.vmem [shape: bf16[2,6,128], index: 0, kind: input, shape index: {}]   ;;  %s2566_s1 = inlined_call_operand.vmem [shape: bf16[128,128], index: 1, kind: input, shape index: {}]   ;;  %s2567_s2 = inlined_call_operand.vmem [shape: f32[1,128], index: 2, kind: input, shape index: {}]   ;;  %s2568_s3 = inlined_call_operand.vmem [shape: bf16[3,128,128], index: 3, kind: input, shape index: {}]   ;;  %s2569_s4 = inlined_call_operand.vmem [shape: f32[1,128], index: 4, kind: input, shape index: {}]   ;;  %s2570_s5 = inlined_call_operand.vmem [shape: bf16[128,128], index: 5, kind: input, shape index: {}]   ;;  %s2571_s6 = inlined_call_operand.vmem [shape: f32[1,128], index: 6, kind: input, shape index: {}]   ;;  %s2572_s7 = inlined_call_operand.vmem [shape: bf16[128,128], index: 7, kind: input, shape index: {}]   ;;  %s2573_s8 = inlined_call_operand.vmem [shape: f32[1,128], index: 8, kind: input, shape index: {}]   ;;  %s2574_s9 = inlined_call_operand.hbm [shape: f32[2,2,128], index: 9, kind: output, shape index: {}]  }
   0x1   :  { %v1930_v0 = vld [vmem:[%s2566_s1] sm:$0xff]   ;;  %1685 = vmatprep.subr.bf16.mxu0 %v2050_v1  ;;  %1705 = vmatprep.subr.bf16.mxu1 %v2050_v1  ;;  %v1931_v2 = vld [vmem:[%s2566_s1 + $0x8] sm:$0xff]   ;;  %v1932_v3 = vld [vmem:[%s2566_s1 + $0x10] sm:$0xff]  }
   0x2   :  { %1686 = vmatpush3.bf16.msra.mxu0 %v1930_v0  ;;  %1701 = vmatprep.mubr.msk.bf16.mxu0 %vm2051_vm0, %v2050_v1  ;;  %v1938_v4 = vld [vmem:[%s2568_s3 + $0x40] sm:$0xff]   ;;  %v1933_v5 = vld [vmem:[%s2566_s1 + $0x18] sm:$0xff]   ;;  %v1940_v6 = vld [vmem:[%s2568_s3 + $0x48] sm:$0xff]  }
   0x3   :  { %1687 = vmatprep.subr.bf16.mxu0 %v2050_v1  ;;  %1721 = vmatprep.mubr.msk.bf16.mxu1 %vm2051_vm0, %v2050_v1  ;;  %v1934_v7 = vld [vmem:[%s2566_s1 + $0x20] sm:$0xff]   ;;  %v1942_v8 = vld [vmem:[%s2568_s3 + $0x50] sm:$0xff]   ;;  %v1935_v9 = vld [vmem:[%s2566_s1 + $0x28] sm:$0xff]  }
   0x4   :  { %1706 = vmatpush3.bf16.msra.mxu1 %v1938_v4  ;;  %v1944_v10 = vld [vmem:[%s2568_s3 + $0x58] sm:$0xff]   ;;  %v1936_v11 = vld [vmem:[%s2566_s1 + $0x30] sm:$0xff]   ;;  %v34_v13 = vld [vmem:[%s2565_s0] sm:$0x7] }
   0x5   :  { %1707 = vmatprep.subr.bf16.mxu1 %v2050_v1  ;;  %v1937_v12 = vld [vmem:[%s2566_s1 + $0x38] sm:$0xff]   ;;  %v1939_v14 = vld [vmem:[%s2568_s3] sm:$0xff]   ;;  %v1941_v15 = vld [vmem:[%s2568_s3 + $0x8] sm:$0xff]  }
   0x6   :  { %1688 = vmatpush3.bf16.msra.mxu0 %v1931_v2  ;;  %v1943_v16 = vld [vmem:[%s2568_s3 + $0x10] sm:$0xff]   ;;  %v1945_v17 = vld [vmem:[%s2568_s3 + $0x18] sm:$0xff]  }
   0x7   :  { %1689 = vmatprep.subr.bf16.mxu0 %v2050_v1 }
   0x8   :  { %1708 = vmatpush3.bf16.msra.mxu1 %v1940_v6 }
   0x9   :  { %1709 = vmatprep.subr.bf16.mxu1 %v2050_v1 }
   0xa   :  { %1690 = vmatpush3.bf16.msra.mxu0 %v1932_v3 }
   0xb   :  { %1691 = vmatprep.subr.bf16.mxu0 %v2050_v1 }
   0xc   :  { %1710 = vmatpush3.bf16.msra.mxu1 %v1942_v8 }
   0xd   :  { %1711 = vmatprep.subr.bf16.mxu1 %v2050_v1 }
   0xe   :  { %1692 = vmatpush3.bf16.msra.mxu0 %v1933_v5 }
   0xf   :  { %1693 = vmatprep.subr.bf16.mxu0 %v2050_v1 }
  0x10   :  { %1712 = vmatpush3.bf16.msra.mxu1 %v1944_v10 }
  0x11   :  { %1713 = vmatprep.subr.bf16.mxu1 %v2050_v1 }
  0x12   :  { %1694 = vmatpush3.bf16.msra.mxu0 %v1934_v7 }
  0x13   :  { %1695 = vmatprep.subr.bf16.mxu0 %v2050_v1 }
  0x16   :  { %1696 = vmatpush3.bf16.msra.mxu0 %v1935_v9 }
  0x17   :  { %1697 = vmatprep.subr.bf16.mxu0 %v2050_v1 }
  0x1a   :  { %1698 = vmatpush3.bf16.msra.mxu0 %v1936_v11 }
  0x1b   :  { %1699 = vmatprep.subr.bf16.mxu0 %v2050_v1 }
  0x1e   :  { %1700 = vmatpush3.bf16.msra.mxu0 %v1937_v12 }
  0x1f   :  { %1725 = vmatprep.subr.bf16.mxu0 %v2050_v1 }
  0x21   :  { %1702 = vmatmul.mubr.bf16.vlgmr.msra.gmra.mrb[0].mxu0 %v34_v13 }
  0x22   :  { %1726 = vmatpush3.bf16.msra.mxu0 %v1939_v14  ;;  %1741 = vmatprep.mubr.msk.bf16.mxu0 %vm2051_vm0, %v2050_v1 }
  0x23   :  { %1727 = vmatprep.subr.bf16.mxu0 %v2050_v1 }
  0x26   :  { %1728 = vmatpush3.bf16.msra.mxu0 %v1941_v15 }
  0x27   :  { %1729 = vmatprep.subr.bf16.mxu0 %v2050_v1 }
  0x2a   :  { %1730 = vmatpush3.bf16.msra.mxu0 %v1943_v16 }
  0x2b   :  { %1731 = vmatprep.subr.bf16.mxu0 %v2050_v1 }
  0x2e   :  { %1732 = vmatpush3.bf16.msra.mxu0 %v1945_v17 }
  0x2f   :  { %1733 = vmatprep.subr.bf16.mxu0 %v2050_v1 }
  0x30   :  { %14 = vsyncpa [#allocation5], 0  ;;  %v1946_v18 = vld [vmem:[%s2568_s3 + $0x60] sm:$0xff]   ;;  %v1948_v20 = vld [vmem:[%s2568_s3 + $0x68] sm:$0xff]   ;;  %s2052_s20 = smov [#allocation4]  }
  0x31   :  { %v1947_v19 = vld [vmem:[%s2568_s3 + $0x20] sm:$0xff]   ;;  %1714 = vmatpush3.bf16.msra.mxu1 %v1946_v18  ;;  %v1949_v21 = vld [vmem:[%s2568_s3 + $0x28] sm:$0xff]   ;;  %v1950_v22 = vld [vmem:[%s2568_s3 + $0x70] sm:$0xff]  }
  0x32   :  { %1734 = vmatpush3.bf16.msra.mxu0 %v1947_v19  ;;  %1715 = vmatprep.subr.bf16.mxu1 %v2050_v1  ;;  %v1951_v23 = vld [vmem:[%s2568_s3 + $0x30] sm:$0xff]   ;;  %v1952_v24 = vld [vmem:[%s2568_s3 + $0x78] sm:$0xff]   ;;  %v2215_v26 = vld [vmem:[%s2567_s2] ss:$0 sm:$0xff]  ;;  %s1397_s2 = sshll.u32 %s2052_s20, 4  ;;  %s1398_s2 = int_to_ptr.vmem [resolvable:$true] %s1397_s2 }
  0x33   :  { %1735 = vmatprep.subr.bf16.mxu0 %v2050_v1  ;;  %v1953_v25 = vld [vmem:[%s2568_s3 + $0x38] sm:$0xff]   ;;  %v1954_v34 = vld [vmem:[%s2568_s3 + $0x80] sm:$0xff]   ;;  %v1955_v39 = vld [vmem:[%s2568_s3 + $0x88] sm:$0xff]   ;;  %p2031_p1 = scmp.lt.s32.totalorder %s1398_s2, %s1398_s2 }
  0x34   :  { %v1956_v40 = vld [vmem:[%s2568_s3 + $0x90] sm:$0xff]   ;;  %v1957_v41 = vld [vmem:[%s2568_s3 + $0x98] sm:$0xff]   ;;  %v1958_v42 = vld [vmem:[%s2568_s3 + $0xa0] sm:$0xff]  }
  0x35   :  { %1716 = vmatpush3.bf16.msra.mxu1 %v1948_v20  ;;  %v1959_v43 = vld [vmem:[%s2568_s3 + $0xa8] sm:$0xff]   ;;  %v1960_v44 = vld [vmem:[%s2568_s3 + $0xb0] sm:$0xff]   ;;  %v1961_v45 = vld [vmem:[%s2568_s3 + $0xb8] sm:$0xff]  }
  0x36   :  { %1736 = vmatpush3.bf16.msra.mxu0 %v1949_v21  ;;  %1717 = vmatprep.subr.bf16.mxu1 %v2050_v1  ;;  %v1962_v48 = vld [vmem:[%s2570_s5] sm:$0xff]   ;;  %v1963_v49 = vld [vmem:[%s2570_s5 + $0x8] sm:$0xff]   ;;  %v1964_v50 = vld [vmem:[%s2570_s5 + $0x10] sm:$0xff]  }
  0x37   :  { %1737 = vmatprep.subr.bf16.mxu0 %v2050_v1  ;;  %v1965_v51 = vld [vmem:[%s2570_s5 + $0x18] sm:$0xff]   ;;  %v1966_v52 = vld [vmem:[%s2570_s5 + $0x20] sm:$0xff]   ;;  %v1967_v53 = vld [vmem:[%s2570_s5 + $0x28] sm:$0xff]  }
  0x38   :  { %v1968_v54 = vld [vmem:[%s2570_s5 + $0x30] sm:$0xff]   ;;  %v1969_v55 = vld [vmem:[%s2570_s5 + $0x38] sm:$0xff]   ;;  %v1978_v56 = vld [vmem:[%s2572_s7] sm:$0xff]  }
  0x39   :  { %1718 = vmatpush3.bf16.msra.mxu1 %v1950_v22  ;;  %v1979_v57 = vld [vmem:[%s2572_s7 + $0x8] sm:$0xff]   ;;  %v1980_v58 = vld [vmem:[%s2572_s7 + $0x10] sm:$0xff]   ;;  %v1981_v59 = vld [vmem:[%s2572_s7 + $0x18] sm:$0xff]  }
  0x3a   :  { %1738 = vmatpush3.bf16.msra.mxu0 %v1951_v23  ;;  %1719 = vmatprep.subr.bf16.mxu1 %v2050_v1  ;;  %v1982_v60 = vld [vmem:[%s2572_s7 + $0x20] sm:$0xff]   ;;  %v1983_v61 = vld [vmem:[%s2572_s7 + $0x28] sm:$0xff]   ;;  %v1972_v20 = vld [vmem:[%s2566_s1 + $0x10] sm:$0xff]  }
  0x3b   :  { %1739 = vmatprep.subr.bf16.mxu0 %v2050_v1  ;;  %v2319_v9 = vld [vmem:[%s2569_s4] ss:$0 sm:$0xff]  ;;  %v1971_v19 = vld [vmem:[%s2566_s1 + $0x8] sm:$0xff]   ;;  %v1973_v21 = vld [vmem:[%s2566_s1 + $0x18] sm:$0xff]  }
  0x3c   :  { %v1970_v17 = vld [vmem:[%s2566_s1] sm:$0xff]   ;;  %v1975_v23 = vld [vmem:[%s2566_s1 + $0x28] sm:$0xff]  }
  0x3d   :  { %1720 = vmatpush3.bf16.msra.mxu1 %v1952_v24  ;;  %v1974_v22 = vld [vmem:[%s2566_s1 + $0x20] sm:$0xff]   ;;  %v1976_v24 = vld [vmem:[%s2566_s1 + $0x30] sm:$0xff]  }
  0x3e   :  { %1740 = vmatpush3.bf16.msra.mxu0 %v1953_v25  ;;  %1745 = vmatprep.subr.bf16.mxu1 %v2050_v1  ;;  %v1977_v25 = vld [vmem:[%s2566_s1 + $0x38] sm:$0xff]  }
  0x3f   :  { %1765 = vmatprep.subr.bf16.mxu0 %v2050_v1 }
  0xf4   :  { %v140_v27 = vpop.f32.mrb[0].mxu0 }
  0xf5   :  { %v141_v28 = vadd.f32 %v2215_v26, %v140_v27  ;;  %v1703_v29 = vpop.f32.mrb[1].mxu0  ;;  %v1492_v27 = vld [vmem:[%s2565_s0 + $0x4] sm:$0x7] }
  0xf6   :  { %v143_v30 = vpop.f32.mrb[2].mxu0  ;;  %v1985_v29 = vld [vmem:[%s2572_s7 + $0x38] sm:$0xff]  }
  0xf7   :  { %vm146_vm1 = vcmp.gt.f32.partialorder %v141_v28, 0.0  ;;  %v147_v31 = vmul.f32 0.2, %v141_v28  ;;  %v1704_v32 = vpop.f32.mrb[3].mxu0  ;;  %v1987_v30 = vld [vmem:[%s2568_s3] sm:$0xff]  }
  0xf8   :  { %v1991_v32 = vld [vmem:[%s2568_s3 + $0x10] sm:$0xff]  }
  0xf9   :  { %v148_v33 = vsel %vm146_vm1, %v141_v28, %v147_v31  ;;  %v1984_v28 = vld [vmem:[%s2572_s7 + $0x30] sm:$0xff]   ;;  %v1989_v31 = vld [vmem:[%s2568_s3 + $0x8] sm:$0xff]  }
  0xfa   :  { %149 = vst [vmem:[#allocation2] sm:$0x3f] %v148_v33  ;;  %v1993_v33 = vld [vmem:[%s2568_s3 + $0x18] sm:$0xff]  }
 0x101   :  { %v2221_v35 = vld [vmem:[#allocation2 + $0x1] ss:$3 sm:$0x3]  ;;  %v150_v36 = vld [vmem:[#allocation2] ss:$3 sm:$0x3] }
 0x102   :  { %v172_v37 = vpack.c.bf16 %v2221_v35, %v2221_v35  ;;  %v155_v38 = vpack.c.bf16 %v150_v36, %v150_v36  ;;  %v154_v46 = vld [vmem:[#allocation2 + $0x2] ss:$3 sm:$0x3]  ;;  %v1997_v36 = vld [vmem:[%s2568_s3 + $0x28] sm:$0xff]  }
 0x103   :  { %v366_v47 = vpack.c.bf16 %v154_v46, %v154_v46 }
 0x104   :  { %1722 = vmatmul.mubr.bf16.vlgmr.msra.gmra.mrb[0].mxu1 %v172_v37  ;;  %1742 = vmatmul.mubr.bf16.vlgmr.msra.gmra.mrb[4].mxu0 %v155_v38  ;;  %v1999_v37 = vld [vmem:[%s2568_s3 + $0x30] sm:$0xff]   ;;  %v2001_v38 = vld [vmem:[%s2568_s3 + $0x38] sm:$0xff]  }
 0x105   :  { %1746 = vmatpush3.bf16.msra.mxu1 %v1954_v34  ;;  %1761 = vmatprep.mubr.msk.bf16.mxu1 %vm2051_vm0, %v2050_v1  ;;  %v1995_v34 = vld [vmem:[%s2568_s3 + $0x20] sm:$0xff]  }
 0x106   :  { %1747 = vmatprep.subr.bf16.mxu1 %v2050_v1  ;;  %1781 = vmatprep.mubr.msk.bf16.mxu0 %vm2051_vm0, %v2050_v1 }
 0x107   :  { %1766 = vmatpush3.bf16.msra.mxu0 %v1962_v48  ;;  %v1986_v48 = vld [vmem:[%s2568_s3 + $0x40] sm:$0xff]  }
 0x108   :  { %1767 = vmatprep.subr.bf16.mxu0 %v2050_v1 }
 0x109   :  { %1748 = vmatpush3.bf16.msra.mxu1 %v1955_v39  ;;  %v2404_v39 = vld [vmem:[%s2571_s6] ss:$0 sm:$0xff] }
 0x10a   :  { %1749 = vmatprep.subr.bf16.mxu1 %v2050_v1 }
 0x10b   :  { %1768 = vmatpush3.bf16.msra.mxu0 %v1963_v49 }
 0x10c   :  { %1769 = vmatprep.subr.bf16.mxu0 %v2050_v1 }
 0x10d   :  { %1750 = vmatpush3.bf16.msra.mxu1 %v1956_v40 }
 0x10e   :  { %1751 = vmatprep.subr.bf16.mxu1 %v2050_v1 }
 0x10f   :  { %1770 = vmatpush3.bf16.msra.mxu0 %v1964_v50  ;;  %v1988_v50 = vld [vmem:[%s2568_s3 + $0x48] sm:$0xff]  }
 0x110   :  { %1771 = vmatprep.subr.bf16.mxu0 %v2050_v1 }
 0x111   :  { %1752 = vmatpush3.bf16.msra.mxu1 %v1957_v41 }
 0x112   :  { %1753 = vmatprep.subr.bf16.mxu1 %v2050_v1 }
 0x113   :  { %1772 = vmatpush3.bf16.msra.mxu0 %v1965_v51  ;;  %v1992_v51 = vld [vmem:[%s2568_s3 + $0x58] sm:$0xff]  }
 0x114   :  { %1773 = vmatprep.subr.bf16.mxu0 %v2050_v1 }
 0x115   :  { %1754 = vmatpush3.bf16.msra.mxu1 %v1958_v42 }
 0x116   :  { %1755 = vmatprep.subr.bf16.mxu1 %v2050_v1 }
 0x117   :  { %1774 = vmatpush3.bf16.msra.mxu0 %v1966_v52  ;;  %v1994_v52 = vld [vmem:[%s2568_s3 + $0x60] sm:$0xff]  }
 0x118   :  { %1775 = vmatprep.subr.bf16.mxu0 %v2050_v1 }
 0x119   :  { %1756 = vmatpush3.bf16.msra.mxu1 %v1959_v43 }
 0x11a   :  { %1757 = vmatprep.subr.bf16.mxu1 %v2050_v1 }
 0x11b   :  { %1776 = vmatpush3.bf16.msra.mxu0 %v1967_v53  ;;  %v1996_v53 = vld [vmem:[%s2568_s3 + $0x68] sm:$0xff]  }
 0x11c   :  { %1777 = vmatprep.subr.bf16.mxu0 %v2050_v1 }
 0x11d   :  { %1758 = vmatpush3.bf16.msra.mxu1 %v1960_v44 }
 0x11e   :  { %1759 = vmatprep.subr.bf16.mxu1 %v2050_v1 }
 0x11f   :  { %1778 = vmatpush3.bf16.msra.mxu0 %v1968_v54  ;;  %v1998_v54 = vld [vmem:[%s2568_s3 + $0x70] sm:$0xff]  }
 0x120   :  { %1779 = vmatprep.subr.bf16.mxu0 %v2050_v1 }
 0x121   :  { %1760 = vmatpush3.bf16.msra.mxu1 %v1961_v45 }
 0x122   :  { %1785 = vmatprep.subr.bf16.mxu1 %v2050_v1 }
 0x123   :  { %1780 = vmatpush3.bf16.msra.mxu0 %v1969_v55 }
 0x124   :  { %1762 = vmatmul.mubr.bf16.vlgmr.msra.gmra.mrb[4].mxu1 %v366_v47  ;;  %1805 = vmatprep.subr.bf16.mxu0 %v2050_v1 }
 0x125   :  { %1801 = vmatprep.mubr.msk.bf16.mxu1 %vm2051_vm0, %v2050_v1  ;;  %1786 = vmatpush3.bf16.msra.mxu1 %v1978_v56 }
 0x126   :  { %1787 = vmatprep.subr.bf16.mxu1 %v2050_v1 }
 0x129   :  { %1788 = vmatpush3.bf16.msra.mxu1 %v1979_v57 }
 0x12a   :  { %1789 = vmatprep.subr.bf16.mxu1 %v2050_v1 }
 0x12d   :  { %1790 = vmatpush3.bf16.msra.mxu1 %v1980_v58 }
 0x12e   :  { %1791 = vmatprep.subr.bf16.mxu1 %v2050_v1 }
 0x131   :  { %1792 = vmatpush3.bf16.msra.mxu1 %v1981_v59 }
 0x132   :  { %1793 = vmatprep.subr.bf16.mxu1 %v2050_v1 }
 0x135   :  { %1794 = vmatpush3.bf16.msra.mxu1 %v1982_v60 }
 0x136   :  { %1795 = vmatprep.subr.bf16.mxu1 %v2050_v1 }
 0x139   :  { %1796 = vmatpush3.bf16.msra.mxu1 %v1983_v61  ;;  %v2000_v61 = vld [vmem:[%s2568_s3 + $0x78] sm:$0xff]  }
 0x13a   :  { %1797 = vmatprep.subr.bf16.mxu1 %v2050_v1 }
 0x13d   :  { %1798 = vmatpush3.bf16.msra.mxu1 %v1984_v28  ;;  %v2023_v28 = vld [vmem:[%s2572_s7 + $0x28] sm:$0xff]  }
 0x13e   :  { %1799 = vmatprep.subr.bf16.mxu1 %v2050_v1 }
 0x141   :  { %1800 = vmatpush3.bf16.msra.mxu1 %v1985_v29  ;;  %v1483_v29 = vld [vmem:[%s2573_s8] ss:$0 sm:$0xff] }
 0x142   :  { %1825 = vmatprep.subr.bf16.mxu1 %v2050_v1 }
 0x1d7   :  { %v272_v62 = vpop.f32.mrb[0].mxu1  ;;  %v360_v63 = vpop.f32.mrb[4].mxu0 }
 0x1d8   :  { %v361_v0 = vadd.f32 %v360_v63, %v272_v62  ;;  %v1723_v2 = vpop.f32.mrb[1].mxu1  ;;  %v1743_v3 = vpop.f32.mrb[5].mxu0 }
 0x1d9   :  { %v275_v4 = vpop.f32.mrb[2].mxu1  ;;  %v363_v5 = vpop.f32.mrb[6].mxu0 }
 0x1da   :  { %v1724_v6 = vpop.f32.mrb[3].mxu1  ;;  %v1744_v7 = vpop.f32.mrb[7].mxu0  ;;  %v2003_v4 = vld [vmem:[%s2568_s3 + $0x88] sm:$0xff]   ;;  %v2004_v5 = vld [vmem:[%s2568_s3 + $0x90] sm:$0xff]  }
 0x1db   :  { %v2005_v6 = vld [vmem:[%s2568_s3 + $0x98] sm:$0xff]   ;;  %v2006_v7 = vld [vmem:[%s2568_s3 + $0xa0] sm:$0xff]  }
 0x1f7   :  { %v466_v8 = vpop.f32.mrb[4].mxu1 }
 0x1f8   :  { %v472_v10 = vadd.f32 %v466_v8, %v361_v0  ;;  %v1763_v11 = vpop.f32.mrb[5].mxu1  ;;  %v2007_v8 = vld [vmem:[%s2568_s3 + $0xa8] sm:$0xff]  }
 0x1f9   :  { %v469_v12 = vpop.f32.mrb[6].mxu1  ;;  %v2009_v11 = vld [vmem:[%s2568_s3 + $0xb8] sm:$0xff]  }
 0x1fa   :  { %v480_v13 = vadd.f32 %v2319_v9, %v472_v10  ;;  %v1764_v14 = vpop.f32.mrb[7].mxu1  ;;  %v2008_v10 = vld [vmem:[%s2568_s3 + $0xb0] sm:$0xff]  }
 0x1fb   :  { %v2010_v14 = vld [vmem:[%s2570_s5] sm:$0xff]  }
 0x1fc   :  { %vm481_vm2 = vcmp.gt.f32.partialorder %v480_v13, 0.0  ;;  %v482_v15 = vmul.f32 0.2, %v480_v13 }
 0x1fe   :  { %v483_v16 = vsel %vm481_vm2, %v480_v13, %v482_v15  ;;  %v2011_v15 = vld [vmem:[%s2570_s5 + $0x8] sm:$0xff]  }
 0x1ff   :  { %v484_v18 = vpack.c.bf16 %v483_v16, %v483_v16  ;;  %v2012_v16 = vld [vmem:[%s2570_s5 + $0x10] sm:$0xff]  }
 0x201   :  { %1782 = vmatmul.mubr.bf16.vlgmr.msra.gmra.mrb[8].mxu0 %v484_v18  ;;  %v2014_v18 = vld [vmem:[%s2570_s5 + $0x20] sm:$0xff]  }
 0x202   :  { %1806 = vmatpush3.bf16.msra.mxu0 %v1970_v17  ;;  %1821 = vmatprep.mubr.msk.bf16.mxu0 %vm2051_vm0, %v2050_v1  ;;  %v2013_v17 = vld [vmem:[%s2570_s5 + $0x18] sm:$0xff]  }
 0x203   :  { %1807 = vmatprep.subr.bf16.mxu0 %v2050_v1 }
 0x206   :  { %1808 = vmatpush3.bf16.msra.mxu0 %v1971_v19  ;;  %v2015_v19 = vld [vmem:[%s2570_s5 + $0x28] sm:$0xff]  }
 0x207   :  { %1809 = vmatprep.subr.bf16.mxu0 %v2050_v1 }
 0x20a   :  { %1810 = vmatpush3.bf16.msra.mxu0 %v1972_v20  ;;  %v2016_v20 = vld [vmem:[%s2570_s5 + $0x30] sm:$0xff]  }
 0x20b   :  { %1811 = vmatprep.subr.bf16.mxu0 %v2050_v1 }
 0x20e   :  { %1812 = vmatpush3.bf16.msra.mxu0 %v1973_v21  ;;  %v2017_v21 = vld [vmem:[%s2570_s5 + $0x38] sm:$0xff]  }
 0x20f   :  { %1813 = vmatprep.subr.bf16.mxu0 %v2050_v1 }
 0x212   :  { %1814 = vmatpush3.bf16.msra.mxu0 %v1974_v22  ;;  %v2018_v22 = vld [vmem:[%s2572_s7] sm:$0xff]  }
 0x213   :  { %1815 = vmatprep.subr.bf16.mxu0 %v2050_v1 }
 0x216   :  { %1816 = vmatpush3.bf16.msra.mxu0 %v1975_v23  ;;  %v2019_v23 = vld [vmem:[%s2572_s7 + $0x8] sm:$0xff]  }
 0x217   :  { %1817 = vmatprep.subr.bf16.mxu0 %v2050_v1 }
 0x21a   :  { %1818 = vmatpush3.bf16.msra.mxu0 %v1976_v24  ;;  %v2020_v24 = vld [vmem:[%s2572_s7 + $0x10] sm:$0xff]  }
 0x21b   :  { %1819 = vmatprep.subr.bf16.mxu0 %v2050_v1 }
 0x21e   :  { %1820 = vmatpush3.bf16.msra.mxu0 %v1977_v25  ;;  %v2021_v25 = vld [vmem:[%s2572_s7 + $0x18] sm:$0xff]  }
 0x21f   :  { %1845 = vmatprep.subr.bf16.mxu0 %v2050_v1 }
 0x221   :  { %1822 = vmatmul.mubr.bf16.vlgmr.msra.gmra.mrb[12].mxu0 %v1492_v27  ;;  %v2022_v27 = vld [vmem:[%s2572_s7 + $0x20] sm:$0xff]  }
 0x222   :  { %1861 = vmatprep.mubr.msk.bf16.mxu0 %vm2051_vm0, %v2050_v1  ;;  %1846 = vmatpush3.bf16.msra.mxu0 %v1987_v30 }
 0x223   :  { %1847 = vmatprep.subr.bf16.mxu0 %v2050_v1 }
 0x226   :  { %1848 = vmatpush3.bf16.msra.mxu0 %v1989_v31 }
 0x227   :  { %1849 = vmatprep.subr.bf16.mxu0 %v2050_v1 }
 0x22a   :  { %1850 = vmatpush3.bf16.msra.mxu0 %v1991_v32 }
 0x22b   :  { %1851 = vmatprep.subr.bf16.mxu0 %v2050_v1 }
 0x22e   :  { %1852 = vmatpush3.bf16.msra.mxu0 %v1993_v33 }
 0x22f   :  { %1853 = vmatprep.subr.bf16.mxu0 %v2050_v1 }
 0x232   :  { %1854 = vmatpush3.bf16.msra.mxu0 %v1995_v34 }
 0x233   :  { %1855 = vmatprep.subr.bf16.mxu0 %v2050_v1 }
 0x236   :  { %1856 = vmatpush3.bf16.msra.mxu0 %v1997_v36 }
 0x237   :  { %1857 = vmatprep.subr.bf16.mxu0 %v2050_v1 }
 0x23a   :  { %1858 = vmatpush3.bf16.msra.mxu0 %v1999_v37 }
 0x23b   :  { %1859 = vmatprep.subr.bf16.mxu0 %v2050_v1 }
 0x23e   :  { %1860 = vmatpush3.bf16.msra.mxu0 %v2001_v38 }
 0x23f   :  { %1885 = vmatprep.subr.bf16.mxu0 %v2050_v1 }
 0x2d4   :  { %v590_v40 = vpop.f32.mrb[8].mxu0 }
 0x2d5   :  { %v591_v41 = vadd.f32 %v2404_v39, %v590_v40  ;;  %v1783_v42 = vpop.f32.mrb[9].mxu0 }
 0x2d6   :  { %v593_v43 = vpop.f32.mrb[10].mxu0 }
 0x2d7   :  { %vm596_vm3 = vcmp.gt.f32.partialorder %v591_v41, 0.0  ;;  %v597_v44 = vmul.f32 0.2, %v591_v41  ;;  %v1784_v45 = vpop.f32.mrb[11].mxu0 }
 0x2d9   :  { %v598_v46 = vsel %vm596_vm3, %v591_v41, %v597_v44 }
 0x2da   :  { %v599_v47 = vadd.f32 %v598_v46, %v2221_v35  ;;  %v1990_v35 = vld [vmem:[%s2568_s3 + $0x50] sm:$0xff]  }
 0x2dc   :  { %v600_v49 = vpack.c.bf16 %v599_v47, %v599_v47 }
 0x2de   :  { %1802 = vmatmul.mubr.bf16.vlgmr.msra.gmra.mrb[8].mxu1 %v600_v49 }
 0x2df   :  { %1826 = vmatpush3.bf16.msra.mxu1 %v1986_v48  ;;  %1841 = vmatprep.mubr.msk.bf16.mxu1 %vm2051_vm0, %v2050_v1 }
 0x2e0   :  { %1827 = vmatprep.subr.bf16.mxu1 %v2050_v1 }
 0x2e3   :  { %1828 = vmatpush3.bf16.msra.mxu1 %v1988_v50 }
 0x2e4   :  { %1829 = vmatprep.subr.bf16.mxu1 %v2050_v1 }
 0x2e7   :  { %1830 = vmatpush3.bf16.msra.mxu1 %v1990_v35 }
 0x2e8   :  { %1831 = vmatprep.subr.bf16.mxu1 %v2050_v1 }
 0x2eb   :  { %1832 = vmatpush3.bf16.msra.mxu1 %v1992_v51 }
 0x2ec   :  { %1833 = vmatprep.subr.bf16.mxu1 %v2050_v1 }
 0x2ef   :  { %1834 = vmatpush3.bf16.msra.mxu1 %v1994_v52 }
 0x2f0   :  { %1835 = vmatprep.subr.bf16.mxu1 %v2050_v1 }
 0x2f3   :  { %1836 = vmatpush3.bf16.msra.mxu1 %v1996_v53 }
 0x2f4   :  { %v820_v55 = vpop.f32.mrb[12].mxu0  ;;  %1837 = vmatprep.subr.bf16.mxu1 %v2050_v1 }
 0x2f5   :  { %v821_v56 = vadd.f32 %v2215_v26, %v820_v55  ;;  %v1823_v57 = vpop.f32.mrb[13].mxu0  ;;  %v2002_v26 = vld [vmem:[%s2568_s3 + $0x80] sm:$0xff]   ;;  %v2025_v55 = vld [vmem:[%s2572_s7 + $0x38] sm:$0xff]  }
 0x2f6   :  { %v823_v58 = vpop.f32.mrb[14].mxu0 }
 0x2f7   :  { %vm826_vm4 = vcmp.gt.f32.partialorder %v821_v56, 0.0  ;;  %v827_v59 = vmul.f32 0.2, %v821_v56  ;;  %v1824_v60 = vpop.f32.mrb[15].mxu0  ;;  %1838 = vmatpush3.bf16.msra.mxu1 %v1998_v54  ;;  %v2024_v54 = vld [vmem:[%s2572_s7 + $0x30] sm:$0xff]   ;;  %s2026_s7 = scalar_lea.vmem %s1398_s2, 64 }
 0x2f8   :  { %1839 = vmatprep.subr.bf16.mxu1 %v2050_v1  ;;  %p2027_p0 = scmp.ne.s32.totalorder %s1398_s2, %s2026_s7  ;;  %p2032_p2 = scmp.lt.s32.totalorder %s2026_s7, %s2026_s7 }
 0x2f9   :  { %v828_v62 = vsel %vm826_vm4, %v821_v56, %v827_v59 }
 0x2fa   :  { %829 = vst [vmem:[#allocation3] sm:$0x3f] %v828_v62  ;;  %p2033_p3 = por %p2032_p2, %p2031_p1 }
 0x2fb   :  { %1840 = vmatpush3.bf16.msra.mxu1 %v2000_v61 }
 0x2fc   :  { %1865 = vmatprep.subr.bf16.mxu1 %v2050_v1  ;;  %p2034_p4 = pnand %p2033_p3, %p2027_p0 }
 0x301   :  { %v2446_v63 = vld [vmem:[#allocation3 + $0x1] ss:$3 sm:$0x3]  ;;  %v830_v0 = vld [vmem:[#allocation3] ss:$3 sm:$0x3] }
 0x302   :  { %v852_v2 = vpack.c.bf16 %v2446_v63, %v2446_v63  ;;  %v835_v3 = vpack.c.bf16 %v830_v0, %v830_v0  ;;  %v834_v12 = vld [vmem:[#allocation3 + $0x2] ss:$3 sm:$0x3] }
 0x303   :  { %v1045_v13 = vpack.c.bf16 %v834_v12, %v834_v12 }
 0x304   :  { %1842 = vmatmul.mubr.bf16.vlgmr.msra.gmra.mrb[12].mxu1 %v852_v2  ;;  %1862 = vmatmul.mubr.bf16.vlgmr.msra.gmra.mrb[16].mxu0 %v835_v3 }
 0x305   :  { %1866 = vmatpush3.bf16.msra.mxu1 %v2002_v26  ;;  %1881 = vmatprep.mubr.msk.bf16.mxu1 %vm2051_vm0, %v2050_v1 }
 0x306   :  { %1867 = vmatprep.subr.bf16.mxu1 %v2050_v1  ;;  %1901 = vmatprep.mubr.msk.bf16.mxu0 %vm2051_vm0, %v2050_v1 }
 0x307   :  { %1886 = vmatpush3.bf16.msra.mxu0 %v2010_v14 }
 0x308   :  { %1887 = vmatprep.subr.bf16.mxu0 %v2050_v1 }
 0x309   :  { %1868 = vmatpush3.bf16.msra.mxu1 %v2003_v4 }
 0x30a   :  { %1869 = vmatprep.subr.bf16.mxu1 %v2050_v1 }
 0x30b   :  { %1888 = vmatpush3.bf16.msra.mxu0 %v2011_v15 }
 0x30c   :  { %1889 = vmatprep.subr.bf16.mxu0 %v2050_v1 }
 0x30d   :  { %1870 = vmatpush3.bf16.msra.mxu1 %v2004_v5 }
 0x30e   :  { %1871 = vmatprep.subr.bf16.mxu1 %v2050_v1 }
 0x30f   :  { %1890 = vmatpush3.bf16.msra.mxu0 %v2012_v16 }
 0x310   :  { %1891 = vmatprep.subr.bf16.mxu0 %v2050_v1 }
 0x311   :  { %1872 = vmatpush3.bf16.msra.mxu1 %v2005_v6 }
 0x312   :  { %1873 = vmatprep.subr.bf16.mxu1 %v2050_v1 }
 0x313   :  { %1892 = vmatpush3.bf16.msra.mxu0 %v2013_v17 }
 0x314   :  { %1893 = vmatprep.subr.bf16.mxu0 %v2050_v1 }
 0x315   :  { %1874 = vmatpush3.bf16.msra.mxu1 %v2006_v7 }
 0x316   :  { %1875 = vmatprep.subr.bf16.mxu1 %v2050_v1 }
 0x317   :  { %1894 = vmatpush3.bf16.msra.mxu0 %v2014_v18 }
 0x318   :  { %1895 = vmatprep.subr.bf16.mxu0 %v2050_v1 }
 0x319   :  { %1876 = vmatpush3.bf16.msra.mxu1 %v2007_v8 }
 0x31a   :  { %1877 = vmatprep.subr.bf16.mxu1 %v2050_v1 }
 0x31b   :  { %1896 = vmatpush3.bf16.msra.mxu0 %v2015_v19 }
 0x31c   :  { %1897 = vmatprep.subr.bf16.mxu0 %v2050_v1 }
 0x31d   :  { %1878 = vmatpush3.bf16.msra.mxu1 %v2008_v10 }
 0x31e   :  { %1879 = vmatprep.subr.bf16.mxu1 %v2050_v1 }
 0x31f   :  { %1898 = vmatpush3.bf16.msra.mxu0 %v2016_v20 }
 0x320   :  { %1899 = vmatprep.subr.bf16.mxu0 %v2050_v1 }
 0x321   :  { %1880 = vmatpush3.bf16.msra.mxu1 %v2009_v11 }
 0x322   :  { %1905 = vmatprep.subr.bf16.mxu1 %v2050_v1 }
 0x323   :  { %1900 = vmatpush3.bf16.msra.mxu0 %v2017_v21 }
 0x324   :  { %1882 = vmatmul.mubr.bf16.vlgmr.msra.gmra.mrb[16].mxu1 %v1045_v13 }
 0x325   :  { %1921 = vmatprep.mubr.msk.bf16.mxu1 %vm2051_vm0, %v2050_v1  ;;  %1906 = vmatpush3.bf16.msra.mxu1 %v2018_v22 }
 0x326   :  { %1907 = vmatprep.subr.bf16.mxu1 %v2050_v1 }
 0x329   :  { %1908 = vmatpush3.bf16.msra.mxu1 %v2019_v23 }
 0x32a   :  { %1909 = vmatprep.subr.bf16.mxu1 %v2050_v1 }
 0x32d   :  { %1910 = vmatpush3.bf16.msra.mxu1 %v2020_v24 }
 0x32e   :  { %1911 = vmatprep.subr.bf16.mxu1 %v2050_v1 }
 0x331   :  { %1912 = vmatpush3.bf16.msra.mxu1 %v2021_v25 }
 0x332   :  { %1913 = vmatprep.subr.bf16.mxu1 %v2050_v1 }
 0x335   :  { %1914 = vmatpush3.bf16.msra.mxu1 %v2022_v27 }
 0x336   :  { %1915 = vmatprep.subr.bf16.mxu1 %v2050_v1 }
 0x339   :  { %1916 = vmatpush3.bf16.msra.mxu1 %v2023_v28 }
 0x33a   :  { %1917 = vmatprep.subr.bf16.mxu1 %v2050_v1 }
 0x33d   :  { %1918 = vmatpush3.bf16.msra.mxu1 %v2024_v54 }
 0x33e   :  { %1919 = vmatprep.subr.bf16.mxu1 %v2050_v1 }
 0x341   :  { %1920 = vmatpush3.bf16.msra.mxu1 %v2025_v55 }
 0x3b1   :  { %v706_v30 = vpop.f32.mrb[8].mxu1 }
 0x3b2   :  { %v707_v31 = vadd.f32 %v1483_v29, %v706_v30  ;;  %v1803_v32 = vpop.f32.mrb[9].mxu1 }
 0x3b3   :  { %v709_v33 = vpop.f32.mrb[10].mxu1 }
 0x3b4   :  { %712 = vst [vmem:[#allocation4] sm:$0x3] %v707_v31  ;;  %v1804_v34 = vpop.f32.mrb[11].mxu1 }
 0x3d7   :  { %v951_v36 = vpop.f32.mrb[12].mxu1  ;;  %v1039_v37 = vpop.f32.mrb[16].mxu0 }
 0x3d8   :  { %v1040_v38 = vadd.f32 %v1039_v37, %v951_v36  ;;  %v1843_v40 = vpop.f32.mrb[13].mxu1  ;;  %v1863_v41 = vpop.f32.mrb[17].mxu0 }
 0x3d9   :  { %v954_v42 = vpop.f32.mrb[14].mxu1  ;;  %v1042_v43 = vpop.f32.mrb[18].mxu0 }
 0x3da   :  { %v1844_v44 = vpop.f32.mrb[15].mxu1  ;;  %v1864_v45 = vpop.f32.mrb[19].mxu0 }
 0x3f7   :  { %v1144_v46 = vpop.f32.mrb[16].mxu1 }
 0x3f8   :  { %v1150_v47 = vadd.f32 %v1144_v46, %v1040_v38  ;;  %v1883_v48 = vpop.f32.mrb[17].mxu1 }
 0x3f9   :  { %v1147_v49 = vpop.f32.mrb[18].mxu1 }
 0x3fa   :  { %v1158_v50 = vadd.f32 %v2319_v9, %v1150_v47  ;;  %v1884_v35 = vpop.f32.mrb[19].mxu1 }
 0x3fc   :  { %vm1159_vm5 = vcmp.gt.f32.partialorder %v1158_v50, 0.0  ;;  %v1160_v51 = vmul.f32 0.2, %v1158_v50 }
 0x3fe   :  { %v1161_v52 = vsel %vm1159_vm5, %v1158_v50, %v1160_v51 }
 0x3ff   :  { %v1162_v53 = vpack.c.bf16 %v1161_v52, %v1161_v52 }
 0x401   :  { %1902 = vmatmul.mubr.bf16.vlgmr.msra.gmra.mrb[20].mxu0 %v1162_v53 }
 0x4d4   :  { %v1268_v56 = vpop.f32.mrb[20].mxu0 }
 0x4d5   :  { %v1269_v9 = vadd.f32 %v2404_v39, %v1268_v56  ;;  %v1903_v57 = vpop.f32.mrb[21].mxu0 }
 0x4d6   :  { %v1271_v58 = vpop.f32.mrb[22].mxu0 }
 0x4d7   :  { %vm1274_vm6 = vcmp.gt.f32.partialorder %v1269_v9, 0.0  ;;  %v1275_v59 = vmul.f32 0.2, %v1269_v9  ;;  %v1904_v60 = vpop.f32.mrb[23].mxu0 }
 0x4d9   :  { %v1276_v61 = vsel %vm1274_vm6, %v1269_v9, %v1275_v59 }
 0x4da   :  { %v1277_v62 = vadd.f32 %v1276_v61, %v2446_v63 }
 0x4dc   :  { %v1278_v26 = vpack.c.bf16 %v1277_v62, %v1277_v62 }
 0x4de   :  { %1922 = vmatmul.mubr.bf16.vlgmr.msra.gmra.mrb[20].mxu1 %v1278_v26 }
 0x5b1   :  { %v1384_v1 = vpop.f32.mrb[20].mxu1 }
 0x5b2   :  { %v1385_v0 = vadd.f32 %v1483_v29, %v1384_v1  ;;  %v1923_v2 = vpop.f32.mrb[21].mxu1 }
 0x5b3   :  { %v1387_v3 = vpop.f32.mrb[22].mxu1 }
 0x5b4   :  { %1391 = vst [vmem:[#allocation4 + $0x2] sm:$0x3] %v1385_v0  ;;  %v1924_v4 = vpop.f32.mrb[23].mxu1 }
 0x5b5   :  { %2037 = shalt.err (!%p2034_p4)
}
 0x5b6   :  { %s2038_s23 = scalar_lea.hbm %s2574_s9, 64 }
 0x5b7   :  { %p2039_p5 = scmp.ne.s32.totalorder %s2574_s9, %s2038_s23  ;;  %p2042_p6 = scmp.lt.u32.totalorder %s2038_s23, %s2574_s9 }
 0x5b9   :  { %p2044_p7 = pnand %p2042_p6, %p2039_p5 }
 0x5bb   :  { %2047 = shalt.err (!%p2044_p7)
}
 0x5bc   :  { %s2053_s27 = smov 32   ;;  %s2054_s28 = smov 2  }
 0x5bd   :  { %1403 = dma.vmem_to_hbm [thread:$0]  %s1398_s2, 64, %s2574_s9, [#allocation5], %s2053_s27, %s2053_s27, %s2054_s28  }
 0x5be   :  { %2048 = dma.done.wait [#allocation5], 64  }
 0x5bf   :  { %2049 = vsyncadd [#allocation5], 4294967232 }
 0x5c0   :  { %1407 = vsyncpa [#allocation5], 1 }

</bundles_post_ra>
